<compile_context>
chip_gen: v7x
topology: tpu7x:2x2x1
jax: 0.10.0
libtpu: 0.0.40
codegen_flags: <defaults>
</compile_context>

<pallas_src>
import functools

import jax
import jax.numpy as jnp
from jax.experimental import pallas as pl
from jax.experimental.pallas import tpu as pltpu

H1, H2, H3 = 512, 256, 128   # hidden sizes fixed by the module definition
EPS = 1e-5                   # nn.BatchNorm1d default eps


def mlp_kernel(x_ref,
               w1_ref, b1_ref,
               w2_ref, b2_ref,
               w3_ref, b3_ref,
               w4_ref, b4_ref,
               out_ref):
    # fc1 (+ folded batchnorm1) -> relu   (x already bf16; f32 accumulation)
    h = jnp.dot(x_ref[...], w1_ref[...],
                preferred_element_type=jnp.float32) + b1_ref[...]
    h = jnp.maximum(h, 0.0).astype(jnp.bfloat16)

    # fc2 (+ folded batchnorm2) -> relu
    h = jnp.dot(h, w2_ref[...],
                preferred_element_type=jnp.float32) + b2_ref[...]
    h = jnp.maximum(h, 0.0).astype(jnp.bfloat16)

    # fc3 -> relu
    h = jnp.dot(h, w3_ref[...],
                preferred_element_type=jnp.float32) + b3_ref[...]
    h = jnp.maximum(h, 0.0).astype(jnp.bfloat16)

    # TODO(synk): nn.Dropout(0.5) is identity in eval mode; training-mode masking not implemented.

    # fc4 (logits, lane-padded to Cp columns); store bf16 (upcast in wrapper).
    logits = jnp.dot(h, w4_ref[...],
                     preferred_element_type=jnp.float32) + b4_ref[...]
    out_ref[...] = logits.astype(out_ref.dtype)


def _round_up(v, m):
    return ((v + m - 1) // m) * m


def _tile_vmem_bytes(tm, D, Cp):
    # x tile (bf16, x2 buffers) + out tile (bf16, x2 buffers)
    # + rough f32 activation temporaries + ~1 MiB resident weights/bias slack.
    return (2 * (2 * tm * D) + 2 * (2 * tm * Cp)
            + tm * (4 * H1 + 4 * H2 + 4 * H3) + (1 << 20))


def mlp_forward(x, prepped, n_classes, *, tm=None):
    """x: (N, ...) float; flattened to (N, D). Returns (N, n_classes) float32."""
    x = x.reshape(x.shape[0], -1)          # x.view(x.size(0), -1)
    N, D = x.shape
    Cp = prepped["w4"].shape[1]            # lane-padded class count (mult of 128)

    if tm is None:
        # Largest batch tile whose double-buffered tiles + temporaries stay well
        # inside the smallest default scoped-VMEM limit (v5e: 16 MiB).
        tm = 2048
        while tm > 512 and _tile_vmem_bytes(tm, D, Cp) > 14 * 1024 * 1024:
            tm //= 2
    # Keep >=2 grid steps when N allows (v7x: 2 TensorCores shard the "parallel"
    # batch axis) and clamp ragged N to a multiple of 16 (bf16 sublane packing)
    # instead of next_power_of_2 so padded-row waste stays small.
    tm = int(max(16, min(tm, _round_up(pl.cdiv(N, 2), 16))))
    n_pad = pl.cdiv(N, tm) * tm

    # Cast the streamed activations to bf16 before the kernel (fuses with the
    # pad under jit) so the dominant recurring HBM stream is halved.
    x = x.astype(jnp.bfloat16)
    if n_pad != N:
        x = jnp.pad(x, ((0, n_pad - N), (0, 0)))

    def row_spec(cols):
        return pl.BlockSpec((tm, cols), lambda i: (i, 0))

    def resident_spec(shape):
        # Constant index_map -> stays resident across the grid; a single
        # pipeline buffer avoids a pointless second copy of each weight/bias.
        return pl.BlockSpec(shape, lambda i: (0, 0), pipeline_mode=pl.Buffered(1))

    in_specs = [
        row_spec(D),
        resident_spec((D, H1)), resident_spec((1, H1)),
        resident_spec((H1, H2)), resident_spec((1, H2)),
        resident_spec((H2, H3)), resident_spec((1, H3)),
        resident_spec((H3, Cp)), resident_spec((1, Cp)),
    ]

    flops = 2 * n_pad * (D * H1 + H1 * H2 + H2 * H3 + H3 * Cp)
    weight_bytes = 2 * (D * H1 + H1 * H2 + H2 * H3 + H3 * Cp)   # bf16 weights
    bias_bytes = 4 * (H1 + H2 + H3 + Cp)                        # f32 biases
    bytes_accessed = (2 * n_pad * D          # bf16 x stream
                      + weight_bytes + bias_bytes
                      + 2 * n_pad * Cp)      # bf16 logits writeback

    out_padded = pl.pallas_call(
        mlp_kernel,
        out_shape=jax.ShapeDtypeStruct((n_pad, Cp), jnp.bfloat16),
        grid_spec=pltpu.PrefetchScalarGridSpec(
            num_scalar_prefetch=0,
            grid=(n_pad // tm,),
            in_specs=in_specs,
            out_specs=row_spec(Cp),
        ),
        compiler_params=pltpu.CompilerParams(
            dimension_semantics=("parallel",)),
        cost_estimate=pl.CostEstimate(
            flops=flops, transcendentals=0, bytes_accessed=bytes_accessed),
    )(x,
      prepped["w1"], prepped["b1"],
      prepped["w2"], prepped["b2"],
      prepped["w3"], prepped["b3"],
      prepped["w4"], prepped["b4"])

    return out_padded[:N, :n_classes].astype(jnp.float32)


def prepare_params(raw):
    """Fold eval-mode BatchNorm into fc1/fc2, cast weights to bf16, pad fc4
    output columns to a lane-dense multiple of 128. Biases stay f32."""
    def fold(w, b, g, be, m, v):
        s = g * jax.lax.rsqrt(v + EPS)                    # (1, H)
        return (w * s).astype(jnp.bfloat16), (b - m) * s + be

    w1, b1 = fold(raw["w1"], raw["b1"], raw["g1"], raw["be1"], raw["m1"], raw["v1"])
    w2, b2 = fold(raw["w2"], raw["b2"], raw["g2"], raw["be2"], raw["m2"], raw["v2"])
    w3 = raw["w3"].astype(jnp.bfloat16)
    b3 = raw["b3"]

    C = raw["w4"].shape[1]
    Cp = pl.cdiv(C, 128) * 128
    w4 = jnp.pad(raw["w4"], ((0, 0), (0, Cp - C))).astype(jnp.bfloat16)
    b4 = jnp.pad(raw["b4"], ((0, 0), (0, Cp - C)))

    return dict(w1=w1, b1=b1, w2=w2, b2=b2, w3=w3, b3=b3, w4=w4, b4=b4)


def init_params(key, input_size, n_classes):
    ks = jax.random.split(key, 12)

    def linear(kw, kb, fan_in, fan_out):
        bound = 1.0 / jnp.sqrt(fan_in)
        w = jax.random.uniform(kw, (fan_in, fan_out), jnp.float32, -bound, bound)
        b = jax.random.uniform(kb, (1, fan_out), jnp.float32, -bound, bound)
        return w, b

    w1, b1 = linear(ks[0], ks[1], input_size, H1)
    w2, b2 = linear(ks[2], ks[3], H1, H2)
    w3, b3 = linear(ks[4], ks[5], H2, H3)
    w4, b4 = linear(ks[6], ks[7], H3, n_classes)

    # BatchNorm1d parameters / running stats (eval-mode); non-trivial so the
    # normalization + affine path is actually exercised.
    g1 = 1.0 + 0.1 * jax.random.normal(ks[8], (1, H1), jnp.float32)
    be1 = 0.1 * jax.random.normal(ks[9], (1, H1), jnp.float32)
    m1 = 0.05 * jax.random.normal(ks[10], (1, H1), jnp.float32)
    v1 = 1.0 + 0.1 * jax.random.uniform(ks[11], (1, H1), jnp.float32)

    k2 = jax.random.split(ks[11], 4)
    g2 = 1.0 + 0.1 * jax.random.normal(k2[0], (1, H2), jnp.float32)
    be2 = 0.1 * jax.random.normal(k2[1], (1, H2), jnp.float32)
    m2 = 0.05 * jax.random.normal(k2[2], (1, H2), jnp.float32)
    v2 = 1.0 + 0.1 * jax.random.uniform(k2[3], (1, H2), jnp.float32)

    return dict(w1=w1, b1=b1, g1=g1, be1=be1, m1=m1, v1=v1,
                w2=w2, b2=b2, g2=g2, be2=be2, m2=m2, v2=v2,
                w3=w3, b3=b3, w4=w4, b4=b4)


def mlp_reference(x, p):
    """Pure-JAX f32 reference on the *raw* (unfolded, unpadded) parameters."""
    h = x @ p["w1"] + p["b1"]
    h = (h - p["m1"]) / jnp.sqrt(p["v1"] + EPS) * p["g1"] + p["be1"]
    h = jnp.maximum(h, 0.0)
    h = h @ p["w2"] + p["b2"]
    h = (h - p["m2"]) / jnp.sqrt(p["v2"] + EPS) * p["g2"] + p["be2"]
    h = jnp.maximum(h, 0.0)
    h = jnp.maximum(h @ p["w3"] + p["b3"], 0.0)
    return h @ p["w4"] + p["b4"]


if __name__ == "__main__":
    key = jax.random.PRNGKey(0)
    k_x, k_p = jax.random.split(key)

    # Small deterministic shapes; N deliberately not a multiple of the tile
    # to exercise the batch-padding path and the >=2-grid-step clamp.
    N, input_size, n_classes = 50, 256, 10
    x = jax.random.normal(k_x, (N, input_size), jnp.float32)

    raw = init_params(k_p, input_size, n_classes)
    params = prepare_params(raw)

    fwd = jax.jit(functools.partial(mlp_forward, n_classes=n_classes))
    logits = jax.block_until_ready(fwd(x, params))

    ref = mlp_reference(x, raw)
    assert logits.shape == (N, n_classes)
    # bf16 matmul operands / bf16 logits store with f32 accumulation
    # -> relaxed tolerance vs f32 reference.
    assert jnp.allclose(logits, ref, atol=5e-2, rtol=5e-2), \
        float(jnp.max(jnp.abs(logits - ref)))
    print("KERNEL_OK")
</pallas_src>

<mosaic_0001>
module attributes {stable_mosaic.version = 11 : i64} {
  func.func @mlp_kernel(%arg0: i32, %arg1: memref<32x256xbf16, #tpu.memory_space<vmem>>, %arg2: memref<256x512xbf16, #tpu.memory_space<vmem>>, %arg3: memref<1x512xf32, #tpu.memory_space<vmem>>, %arg4: memref<512x256xbf16, #tpu.memory_space<vmem>>, %arg5: memref<1x256xf32, #tpu.memory_space<vmem>>, %arg6: memref<256x128xbf16, #tpu.memory_space<vmem>>, %arg7: memref<1x128xf32, #tpu.memory_space<vmem>>, %arg8: memref<128x128xbf16, #tpu.memory_space<vmem>>, %arg9: memref<1x128xf32, #tpu.memory_space<vmem>>, %arg10: memref<32x128xbf16, #tpu.memory_space<vmem>>) attributes {dimension_semantics = [#tpu.dimension_semantics<parallel>], iteration_bounds = array<i64: 2>, scalar_prefetch = 0 : i64, scratch_operands = 0 : i64, tpu.core_type = #tpu.core_type<tc>, window_params = [{transform_indices = @transform_0, window_bounds = array<i64: 32, 256>}, {pipeline_mode = #tpu.pipeline_mode<synchronous>, transform_indices = @transform_1, window_bounds = array<i64: 256, 512>}, {pipeline_mode = #tpu.pipeline_mode<synchronous>, transform_indices = @transform_2, window_bounds = array<i64: 1, 512>}, {pipeline_mode = #tpu.pipeline_mode<synchronous>, transform_indices = @transform_3, window_bounds = array<i64: 512, 256>}, {pipeline_mode = #tpu.pipeline_mode<synchronous>, transform_indices = @transform_4, window_bounds = array<i64: 1, 256>}, {pipeline_mode = #tpu.pipeline_mode<synchronous>, transform_indices = @transform_5, window_bounds = array<i64: 256, 128>}, {pipeline_mode = #tpu.pipeline_mode<synchronous>, transform_indices = @transform_6, window_bounds = array<i64: 1, 128>}, {pipeline_mode = #tpu.pipeline_mode<synchronous>, transform_indices = @transform_7, window_bounds = array<i64: 128, 128>}, {pipeline_mode = #tpu.pipeline_mode<synchronous>, transform_indices = @transform_8, window_bounds = array<i64: 1, 128>}, {transform_indices = @transform_9, window_bounds = array<i64: 32, 128>}]} {
    %c0 = arith.constant 0 : index
    %c0_0 = arith.constant 0 : index
    %0 = vector.load %arg1[%c0, %c0_0] : memref<32x256xbf16, #tpu.memory_space<vmem>>, vector<32x256xbf16>
    %c0_1 = arith.constant 0 : index
    %c0_2 = arith.constant 0 : index
    %1 = vector.load %arg2[%c0_1, %c0_2] : memref<256x512xbf16, #tpu.memory_space<vmem>>, vector<256x512xbf16>
    %cst = arith.constant dense<0.000000e+00> : vector<32x512xf32>
    %2 = tpu.matmul %0, %1, %cst {dimension_numbers = #tpu.dot_dimension_numbers<[1], [0], [0], [1], [0, 0, 1, 1], [], []>} : vector<32x256xbf16>, vector<256x512xbf16>, vector<32x512xf32> -> vector<32x512xf32>
    %c0_3 = arith.constant 0 : index
    %c0_4 = arith.constant 0 : index
    %3 = vector.load %arg3[%c0_3, %c0_4] : memref<1x512xf32, #tpu.memory_space<vmem>>, vector<1x512xf32>
    %4 = vector.broadcast %3 : vector<1x512xf32> to vector<32x512xf32>
    %5 = arith.addf %2, %4 : vector<32x512xf32>
    %cst_5 = arith.constant 0.000000e+00 : f32
    %6 = vector.broadcast %cst_5 : f32 to vector<32x512xf32>
    %7 = arith.maximumf %5, %6 : vector<32x512xf32>
    %8 = arith.truncf %7 : vector<32x512xf32> to vector<32x512xbf16>
    %c0_6 = arith.constant 0 : index
    %c0_7 = arith.constant 0 : index
    %9 = vector.load %arg4[%c0_6, %c0_7] : memref<512x256xbf16, #tpu.memory_space<vmem>>, vector<512x256xbf16>
    %cst_8 = arith.constant dense<0.000000e+00> : vector<32x256xf32>
    %10 = tpu.matmul %8, %9, %cst_8 {dimension_numbers = #tpu.dot_dimension_numbers<[1], [0], [0], [1], [0, 0, 1, 1], [], []>} : vector<32x512xbf16>, vector<512x256xbf16>, vector<32x256xf32> -> vector<32x256xf32>
    %c0_9 = arith.constant 0 : index
    %c0_10 = arith.constant 0 : index
    %11 = vector.load %arg5[%c0_9, %c0_10] : memref<1x256xf32, #tpu.memory_space<vmem>>, vector<1x256xf32>
    %12 = vector.broadcast %11 : vector<1x256xf32> to vector<32x256xf32>
    %13 = arith.addf %10, %12 : vector<32x256xf32>
    %cst_11 = arith.constant 0.000000e+00 : f32
    %14 = vector.broadcast %cst_11 : f32 to vector<32x256xf32>
    %15 = arith.maximumf %13, %14 : vector<32x256xf32>
    %16 = arith.truncf %15 : vector<32x256xf32> to vector<32x256xbf16>
    %c0_12 = arith.constant 0 : index
    %c0_13 = arith.constant 0 : index
    %17 = vector.load %arg6[%c0_12, %c0_13] : memref<256x128xbf16, #tpu.memory_space<vmem>>, vector<256x128xbf16>
    %cst_14 = arith.constant dense<0.000000e+00> : vector<32x128xf32>
    %18 = tpu.matmul %16, %17, %cst_14 {dimension_numbers = #tpu.dot_dimension_numbers<[1], [0], [0], [1], [0, 0, 1, 1], [], []>} : vector<32x256xbf16>, vector<256x128xbf16>, vector<32x128xf32> -> vector<32x128xf32>
    %c0_15 = arith.constant 0 : index
    %c0_16 = arith.constant 0 : index
    %19 = vector.load %arg7[%c0_15, %c0_16] : memref<1x128xf32, #tpu.memory_space<vmem>>, vector<1x128xf32>
    %20 = vector.broadcast %19 : vector<1x128xf32> to vector<32x128xf32>
    %21 = arith.addf %18, %20 : vector<32x128xf32>
    %cst_17 = arith.constant 0.000000e+00 : f32
    %22 = vector.broadcast %cst_17 : f32 to vector<32x128xf32>
    %23 = arith.maximumf %21, %22 : vector<32x128xf32>
    %24 = arith.truncf %23 : vector<32x128xf32> to vector<32x128xbf16>
    %c0_18 = arith.constant 0 : index
    %c0_19 = arith.constant 0 : index
    %25 = vector.load %arg8[%c0_18, %c0_19] : memref<128x128xbf16, #tpu.memory_space<vmem>>, vector<128x128xbf16>
    %cst_20 = arith.constant dense<0.000000e+00> : vector<32x128xf32>
    %26 = tpu.matmul %24, %25, %cst_20 {dimension_numbers = #tpu.dot_dimension_numbers<[1], [0], [0], [1], [0, 0, 1, 1], [], []>} : vector<32x128xbf16>, vector<128x128xbf16>, vector<32x128xf32> -> vector<32x128xf32>
    %c0_21 = arith.constant 0 : index
    %c0_22 = arith.constant 0 : index
    %27 = vector.load %arg9[%c0_21, %c0_22] : memref<1x128xf32, #tpu.memory_space<vmem>>, vector<1x128xf32>
    %28 = vector.broadcast %27 : vector<1x128xf32> to vector<32x128xf32>
    %29 = arith.addf %26, %28 : vector<32x128xf32>
    %30 = arith.truncf %29 : vector<32x128xf32> to vector<32x128xbf16>
    %c0_23 = arith.constant 0 : index
    %c0_24 = arith.constant 0 : index
    %31 = vector.load %arg10[%c0_23, %c0_24] : memref<32x128xbf16, #tpu.memory_space<vmem>>, vector<32x128xbf16>
    tpu.vector_store %arg10[%c0_23, %c0_24], %30 {strides = array<i32>} : memref<32x128xbf16, #tpu.memory_space<vmem>>, vector<32x128xbf16>,
    return
  }
  func.func @transform_0(%arg0: i32) -> (i32, i32) {
    %c0_i32 = arith.constant 0 : i32
    %c0_i32_0 = arith.constant 0 : i32
    return %arg0, %c0_i32 : i32, i32
  }
  func.func @transform_1(%arg0: i32) -> (i32, i32) {
    %c0_i32 = arith.constant 0 : i32
    %c0_i32_0 = arith.constant 0 : i32
    %c0_i32_1 = arith.constant 0 : i32
    return %c0_i32, %c0_i32_0 : i32, i32
  }
  func.func @transform_2(%arg0: i32) -> (i32, i32) {
    %c0_i32 = arith.constant 0 : i32
    %c0_i32_0 = arith.constant 0 : i32
    %c0_i32_1 = arith.constant 0 : i32
    return %c0_i32, %c0_i32_0 : i32, i32
  }
  func.func @transform_3(%arg0: i32) -> (i32, i32) {
    %c0_i32 = arith.constant 0 : i32
    %c0_i32_0 = arith.constant 0 : i32
    %c0_i32_1 = arith.constant 0 : i32
    return %c0_i32, %c0_i32_0 : i32, i32
  }
  func.func @transform_4(%arg0: i32) -> (i32, i32) {
    %c0_i32 = arith.constant 0 : i32
    %c0_i32_0 = arith.constant 0 : i32
    %c0_i32_1 = arith.constant 0 : i32
    return %c0_i32, %c0_i32_0 : i32, i32
  }
  func.func @transform_5(%arg0: i32) -> (i32, i32) {
    %c0_i32 = arith.constant 0 : i32
    %c0_i32_0 = arith.constant 0 : i32
    %c0_i32_1 = arith.constant 0 : i32
    return %c0_i32, %c0_i32_0 : i32, i32
  }
  func.func @transform_6(%arg0: i32) -> (i32, i32) {
    %c0_i32 = arith.constant 0 : i32
    %c0_i32_0 = arith.constant 0 : i32
    %c0_i32_1 = arith.constant 0 : i32
    return %c0_i32, %c0_i32_0 : i32, i32
  }
  func.func @transform_7(%arg0: i32) -> (i32, i32) {
    %c0_i32 = arith.constant 0 : i32
    %c0_i32_0 = arith.constant 0 : i32
    %c0_i32_1 = arith.constant 0 : i32
    return %c0_i32, %c0_i32_0 : i32, i32
  }
  func.func @transform_8(%arg0: i32) -> (i32, i32) {
    %c0_i32 = arith.constant 0 : i32
    %c0_i32_0 = arith.constant 0 : i32
    %c0_i32_1 = arith.constant 0 : i32
    return %c0_i32, %c0_i32_0 : i32, i32
  }
  func.func @transform_9(%arg0: i32) -> (i32, i32) {
    %c0_i32 = arith.constant 0 : i32
    %c0_i32_0 = arith.constant 0 : i32
    return %arg0, %c0_i32 : i32, i32
  }
}

</mosaic_0001>

<bundles_post_ra>
// kernel: mlp_forward.1
= control target key start
LH: loop header
LB: loop body
LE: loop exit
PB: predicated region body
PF: predicated region fallthrough
CT: control target
= control target key end

     0   :  { %14 = vsyncpa [#allocation3], 0  ;;  %s2729_s0 = inlined_call_operand.vmem [shape: bf16[64,256], index: 0, kind: input, shape index: {}]   ;;  %s2730_s1 = inlined_call_operand.hbm [shape: bf16[256,512], index: 1, kind: input, shape index: {}]   ;;  %s2731_s2 = inlined_call_operand.vmem [shape: f32[1,512], index: 2, kind: input, shape index: {}]   ;;  %s2732_s3 = inlined_call_operand.hbm [shape: bf16[512,256], index: 3, kind: input, shape index: {}]   ;;  %s2733_s4 = inlined_call_operand.vmem [shape: f32[1,256], index: 4, kind: input, shape index: {}]   ;;  %s2734_s5 = inlined_call_operand.vmem [shape: bf16[256,128], index: 5, kind: input, shape index: {}]   ;;  %s2735_s6 = inlined_call_operand.vmem [shape: f32[1,128], index: 6, kind: input, shape index: {}]   ;;  %s2736_s7 = inlined_call_operand.vmem [shape: bf16[128,128], index: 7, kind: input, shape index: {}]   ;;  %s2737_s8 = inlined_call_operand.vmem [shape: f32[1,128], index: 8, kind: input, shape index: {}]   ;;  %s2738_s9 = inlined_call_operand.vmem [shape: bf16[64,128], index: 9, kind: output, shape index: {}]  }
   0x1   :  { %15 = vsyncpa [#allocation5], 0  ;;  %s2503_s30 = smov 0  }
   0x2 LB: > { %s2447_s10 = smov [#allocation2]   ;;  %s1852_s12 = sadd.s32 4294967295, %s2445_s30   ;;  %s2445_s30 = sphi %s2503_s30, %s21_s30  }
   0x3   : > { %s258_s11 = sshll.u32 %s2447_s10, 4  ;;  %p1854_p0 = scmp.ge.s32.totalorder %s2445_s30, 1  ;;  %s259_s11 = int_to_ptr.vmem [resolvable:$true] %s258_s11 }
   0x4   : > { %p246_p1 = scmp.lt.s32.totalorder %s2445_s30, 3  ;;  %p2517_p3 = scmp.eq.s32.totalorder %s1852_s12, 0 }
   0x5   : > { %s2448_s15 = smov [#allocation4]   ;;  %s2375_s20 = scalar_lea.hbm %s2730_s1, 8192 }
   0x6   : > { %p2511_p2 = pnand %p1854_p0, %p246_p1  ;;  %s274_s16 = sshll.u32 %s2448_s15, 4  ;;  %s2529_s16 = int_to_ptr.vmem [resolvable:$true] %s274_s16 }
   0x7   : > { %s2743_s14 = scalar_select %p2517_p3, 1, 0 }
   0x8   : > { %s2742_s13 = scalar_select %p2511_p2, 1, 0 }
   0x9   : > { %p2128_p4 = pneg %p2511_p2  ;;  %p2376_p6 = scmp.ne.s32.totalorder %s2730_s1, %s2375_s20 }
   0xa   : > { %p2382_p10 = scmp.lt.u32.totalorder %s2375_s20, %s2730_s1 }
   0xb   : > { %p2525_p5 = pnand %p2517_p3, %p2128_p4 }
   0xd   : > { %p2377_p7 = pneg %p2525_p5 }
   0xf   : > { %p2378_p8 = pnand %p2377_p7, %p2376_p6 }
  0x11   : > { %p2379_p9 = pneg %p2378_p8 }
  0x13   : > { %p2384_p11 = pnand %p2382_p10, %p2379_p9 }
  0x15   : > { %2387 = shalt.err (!%p2384_p11)
}
  0x16   : > { %s2388_s25 = scalar_lea.vmem %s259_s11, 8192  ;;  %p2396_p1 = scmp.lt.s32.totalorder %s259_s11, %s259_s11 }
  0x17   : > { %p2389_p12 = scmp.ne.s32.totalorder %s259_s11, %s2388_s25  ;;  %p2397_p4 = scmp.lt.s32.totalorder %s2388_s25, %s2388_s25 }
  0x19   : > { %p2391_p13 = pnand %p2389_p12, %p2377_p7  ;;  %p2398_p3 = por %p2397_p4, %p2396_p1 }
  0x1b   : > { %p2392_p0 = pneg %p2391_p13 }
  0x1d   : > { %p2399_p2 = pnand %p2398_p3, %p2392_p0 }
  0x1f   : > { %2402 = shalt.err (!%p2399_p2)
}
  0x20   : > { %s2449_s26 = smov 256   ;;  %s2450_s27 = smov 16  }
  0x21   : > { %2131 = dma.hbm_to_vmem [thread:$0]  (!%p2525_p5), %s2730_s1, 8192, %s259_s11, [#allocation3], %s2449_s26, %s2449_s26, %s2450_s27  }
  0x22   : > { %s2403_s18 = scalar_lea.hbm %s2732_s3, 8192 }
  0x23   : > { %p2404_p6 = scmp.ne.s32.totalorder %s2732_s3, %s2403_s18  ;;  %p2410_p8 = scmp.lt.u32.totalorder %s2403_s18, %s2732_s3 }
  0x25   : > { %p2406_p2 = pnand %p2404_p6, %p2377_p7 }
  0x27   : > { %p2407_p3 = pneg %p2406_p2 }
  0x29   : > { %p2412_p9 = pnand %p2410_p8, %p2407_p3 }
  0x2b   : > { %2415 = shalt.err (!%p2412_p9)
}
  0x2c   : > { %s2416_s11 = scalar_lea.vmem %s2529_s16, 8192  ;;  %p2424_p13 = scmp.lt.s32.totalorder %s2529_s16, %s2529_s16 }
  0x2d   : > { %p2417_p10 = scmp.ne.s32.totalorder %s2529_s16, %s2416_s11  ;;  %p2425_p0 = scmp.lt.s32.totalorder %s2416_s11, %s2416_s11 }
  0x2f   : > { %p2419_p11 = pnand %p2417_p10, %p2377_p7  ;;  %p2426_p1 = por %p2425_p0, %p2424_p13 }
  0x31   : > { %p2420_p12 = pneg %p2419_p11 }
  0x33   : > { %p2427_p4 = pnand %p2426_p1, %p2420_p12 }
  0x35   : > { %2430 = shalt.err (!%p2427_p4)
}
  0x36   : > { %s2451_s23 = smov 128   ;;  %s2452_s24 = smov 8  }
  0x37   : > { %2134 = dma.hbm_to_vmem [thread:$0]  (!%p2525_p5), %s2732_s3, 8192, %s2529_s16, [#allocation5], %s2451_s23, %s2451_s23, %s2452_s24  }
  0x38   : > { %p2745_p6 = scmp.ne.s32.totalorder %s2742_s13, 0 }
  0x39   : > { %p2746_p7 = scmp.ne.s32.totalorder (!%p2745_p6), %s2743_s14, 0 }
  0x3a   : > { %315 = sbr.rel (%p2745_p6) target bundleno = 1092 (0x444), region = 56 }
  0x41   : > { %2436 = dma.done.wait (%p2746_p7), [#allocation3], 8192  }
  0x42   : > { %2438 = vsyncadd (%p2746_p7), [#allocation3], 4294959104 }
  0x43   : > { %2440 = dma.done.wait (%p2746_p7), [#allocation5], 8192  }
  0x44   : > { %2442 = vsyncadd (%p2746_p7), [#allocation5], 4294959104  ;;  %v2153_v0 = vld [vmem:[#allocation2 + $0x4] ss:$16 sps:$4 sm:$0xff]   ;;  %v2155_v1 = vld [vmem:[#allocation2] ss:$16 sps:$4 sm:$0xff]  }
  0x45   : > { %800 = vmatprep.subr.bf16.mxu1 %v2153_v0  ;;  %v2156_v2 = vld [vmem:[#allocation2 + $0x24] ss:$16 sps:$4 sm:$0xff]   ;;  %v2158_v3 = vld [vmem:[#allocation2 + $0x20] ss:$16 sps:$4 sm:$0xff]   ;;  %s1861_s13 = sshll.u32 %s1852_s12, 2 }
  0x46   : > { %801 = vmatpush1.bf16.msra.mxu1 %v2155_v1  ;;  %v2159_v4 = vld [vmem:[#allocation2 + $0x44] ss:$16 sps:$4 sm:$0xff]   ;;  %v2161_v5 = vld [vmem:[#allocation2 + $0x40] ss:$16 sps:$4 sm:$0xff]   ;;  %p357_p5 = scmp.lt.s32.totalorder %s1861_s13, 7 }
  0x47   : > { %802 = vmatprep.subr.bf16.mxu1 %v2156_v2  ;;  %v2162_v6 = vld [vmem:[#allocation2 + $0x64] ss:$16 sps:$4 sm:$0xff]   ;;  %v2164_v7 = vld [vmem:[#allocation2 + $0x60] ss:$16 sps:$4 sm:$0xff]   ;;  %v2206_v43 = vld [vmem:[#allocation2 + $0xc] ss:$16 sps:$4 sm:$0xff]  }
  0x48   : > { %v2165_v8 = vld [vmem:[#allocation2 + $0x84] ss:$16 sps:$4 sm:$0xff]   ;;  %s2748_s13 = smov (!%p357_p5, %s1861_s13), 7  ;;  %v2167_v9 = vld [vmem:[#allocation2 + $0x80] ss:$16 sps:$4 sm:$0xff]  }
  0x49   : > { %v2168_v10 = vld [vmem:[#allocation2 + $0xa4] ss:$16 sps:$4 sm:$0xff]   ;;  %s2030_s14 = sshll.u32 %s2748_s13, 3  ;;  %v2170_v11 = vld [vmem:[#allocation2 + $0xa0] ss:$16 sps:$4 sm:$0xff]  }
  0x4a   : > { %803 = vmatpush1.bf16.msra.mxu1 %v2158_v3  ;;  %s2596_s17 = scalar_lea.vmem %s2729_s0, %s2030_s14  ;;  %v2171_v12 = vld [vmem:[#allocation2 + $0xc4] ss:$16 sps:$4 sm:$0xff]   ;;  %v2173_v14 = vld [vmem:[#allocation2 + $0xc0] ss:$16 sps:$4 sm:$0xff]   ;;  %v2204_v44 = vld [vmem:[#allocation2 + $0x8] ss:$16 sps:$4 sm:$0xff]  }
  0x4b   : > { %804 = vmatprep.subr.bf16.mxu1 %v2159_v4  ;;  %v2599_v13 = vld [vmem:[%s2596_s17 + $0x4] ss:$8 sps:$4 sm:$0xff]   ;;  %v2176_v16 = vld [vmem:[#allocation2 + $0xe0] ss:$16 sps:$4 sm:$0xff]   ;;  %v2258_v29 = vld [vmem:[#allocation4 + $0x14] ss:$8 sps:$4 sm:$0xff]  }
  0x4c   : > { %v2174_v15 = vld [vmem:[#allocation2 + $0xe4] ss:$16 sps:$4 sm:$0xff]   ;;  %832 = vmatprep.mubr.bf16.mxu1 %v2599_v13  ;;  %v2179_v18 = vld [vmem:[#allocation2 + $0x100] ss:$16 sps:$4 sm:$0xff]   ;;  %v2209_v46 = vld [vmem:[#allocation2 + $0x2c] ss:$16 sps:$4 sm:$0xff]  }
  0x4d   : > { %v2177_v17 = vld [vmem:[#allocation2 + $0x104] ss:$16 sps:$4 sm:$0xff]   ;;  %v2182_v20 = vld [vmem:[#allocation2 + $0x120] ss:$16 sps:$4 sm:$0xff]   ;;  %v2207_v51 = vld [vmem:[#allocation2 + $0x28] ss:$16 sps:$4 sm:$0xff]  }
  0x4e   : > { %805 = vmatpush1.bf16.msra.mxu1 %v2161_v5  ;;  %v2180_v19 = vld [vmem:[#allocation2 + $0x124] ss:$16 sps:$4 sm:$0xff]   ;;  %v2185_v22 = vld [vmem:[#allocation2 + $0x140] ss:$16 sps:$4 sm:$0xff]   ;;  %v2212_v52 = vld [vmem:[#allocation2 + $0x4c] ss:$16 sps:$4 sm:$0xff]  }
  0x4f   : > { %806 = vmatprep.subr.bf16.mxu1 %v2162_v6  ;;  %v2183_v21 = vld [vmem:[#allocation2 + $0x144] ss:$16 sps:$4 sm:$0xff]   ;;  %v2188_v24 = vld [vmem:[#allocation2 + $0x160] ss:$16 sps:$4 sm:$0xff]   ;;  %v2210_v56 = vld [vmem:[#allocation2 + $0x48] ss:$16 sps:$4 sm:$0xff]  }
  0x50   : > { %v2186_v23 = vld [vmem:[#allocation2 + $0x164] ss:$16 sps:$4 sm:$0xff]   ;;  %v2257_v27 = vld [vmem:[#allocation4] ss:$8 sps:$4 sm:$0xff]   ;;  %v2260_v31 = vld [vmem:[#allocation4 + $0x10] ss:$8 sps:$4 sm:$0xff]  }
  0x51   : > { %v2189_v25 = vld [vmem:[#allocation2 + $0x184] ss:$16 sps:$4 sm:$0xff]   ;;  %v2191_v28 = vld [vmem:[#allocation2 + $0x180] ss:$16 sps:$4 sm:$0xff]   ;;  %v2215_v57 = vld [vmem:[#allocation2 + $0x6c] ss:$16 sps:$4 sm:$0xff]  }
  0x52   : > { %807 = vmatpush1.bf16.msra.mxu1 %v2164_v7  ;;  %v2255_v26 = vld [vmem:[#allocation4 + $0x4] ss:$8 sps:$4 sm:$0xff]   ;;  %v2194_v33 = vld [vmem:[#allocation2 + $0x1a0] ss:$16 sps:$4 sm:$0xff]   ;;  %v2264_v36 = vld [vmem:[#allocation4 + $0x34] ss:$8 sps:$4 sm:$0xff]  }
  0x53   : > { %808 = vmatprep.subr.bf16.mxu1 %v2165_v8  ;;  %v2192_v30 = vld [vmem:[#allocation2 + $0x1a4] ss:$16 sps:$4 sm:$0xff]   ;;  %1326 = vmatprep.subr.bf16.mxu0 %v2255_v26  ;;  %v2263_v35 = vld [vmem:[#allocation4 + $0x20] ss:$8 sps:$4 sm:$0xff]   ;;  %v2266_v39 = vld [vmem:[#allocation4 + $0x30] ss:$8 sps:$4 sm:$0xff]  }
  0x54   : > { %1327 = vmatpush1.bf16.msra.mxu0 %v2257_v27  ;;  %v2261_v32 = vld [vmem:[#allocation4 + $0x24] ss:$8 sps:$4 sm:$0xff]   ;;  %v2197_v37 = vld [vmem:[#allocation2 + $0x1c0] ss:$16 sps:$4 sm:$0xff]   ;;  %v2270_v47 = vld [vmem:[#allocation4 + $0x54] ss:$8 sps:$4 sm:$0xff]  }
  0x55   : > { %1328 = vmatprep.subr.bf16.mxu0 %v2258_v29  ;;  %v2195_v34 = vld [vmem:[#allocation2 + $0x1c4] ss:$16 sps:$4 sm:$0xff]   ;;  %v2200_v41 = vld [vmem:[#allocation2 + $0x1e0] ss:$16 sps:$4 sm:$0xff]   ;;  %v2213_v60 = vld [vmem:[#allocation2 + $0x68] ss:$16 sps:$4 sm:$0xff]  }
  0x56   : > { %809 = vmatpush1.bf16.msra.mxu1 %v2167_v9  ;;  %v2198_v38 = vld [vmem:[#allocation2 + $0x1e4] ss:$16 sps:$4 sm:$0xff]   ;;  %v2603_v42 = vld [vmem:[%s2596_s17] ss:$8 sps:$4 sm:$0xff]   ;;  %v2272_v49 = vld [vmem:[#allocation4 + $0x50] ss:$8 sps:$4 sm:$0xff]  }
  0x57   : > { %810 = vmatprep.subr.bf16.mxu1 %v2168_v10  ;;  %v2267_v40 = vld [vmem:[#allocation4 + $0x44] ss:$8 sps:$4 sm:$0xff]   ;;  %v2269_v45 = vld [vmem:[#allocation4 + $0x40] ss:$8 sps:$4 sm:$0xff]   ;;  %v2606_v48 = vld [vmem:[%s2596_s17 + $0x14] ss:$8 sps:$4 sm:$0xff]  }
  0x58   : > { %1329 = vmatpush1.bf16.msra.mxu0 %v2260_v31  ;;  %v2273_v50 = vld [vmem:[#allocation4 + $0x64] ss:$8 sps:$4 sm:$0xff]   ;;  %v2275_v53 = vld [vmem:[#allocation4 + $0x60] ss:$8 sps:$4 sm:$0xff]   ;;  %v2611_v54 = vld [vmem:[%s2596_s17 + $0x10] ss:$8 sps:$4 sm:$0xff]  }
  0x59   : > { %1330 = vmatprep.subr.bf16.mxu0 %v2261_v32  ;;  %v2276_v55 = vld [vmem:[#allocation4 + $0x74] ss:$8 sps:$4 sm:$0xff]   ;;  %v2278_v58 = vld [vmem:[#allocation4 + $0x70] ss:$8 sps:$4 sm:$0xff]   ;;  %v2279_v59 = vld [vmem:[#allocation4 + $0x84] ss:$8 sps:$4 sm:$0xff]  }
  0x5a   : > { %811 = vmatpush1.bf16.msra.mxu1 %v2170_v11  ;;  %v2218_v61 = vld [vmem:[#allocation2 + $0x8c] ss:$16 sps:$4 sm:$0xff]   ;;  %v2281_v62 = vld [vmem:[#allocation4 + $0x80] ss:$8 sps:$4 sm:$0xff]   ;;  %v2284_v2 = vld [vmem:[#allocation4 + $0x90] ss:$8 sps:$4 sm:$0xff]  }
  0x5b   : > { %812 = vmatprep.subr.bf16.mxu1 %v2171_v12  ;;  %v2282_v63 = vld [vmem:[#allocation4 + $0x94] ss:$8 sps:$4 sm:$0xff]   ;;  %v2216_v0 = vld [vmem:[#allocation2 + $0x88] ss:$16 sps:$4 sm:$0xff]   ;;  %v2285_v3 = vld [vmem:[#allocation4 + $0xa4] ss:$8 sps:$4 sm:$0xff]  }
  0x5c   : > { %1331 = vmatpush1.bf16.msra.mxu0 %v2263_v35  ;;  %v2221_v1 = vld [vmem:[#allocation2 + $0xac] ss:$16 sps:$4 sm:$0xff]   ;;  %v2219_v4 = vld [vmem:[#allocation2 + $0xa8] ss:$16 sps:$4 sm:$0xff]   ;;  %s1865_s17 = sshll.u32 %s2748_s13, 2 }
  0x5d   : > { %1332 = vmatprep.subr.bf16.mxu0 %v2264_v36  ;;  %v2224_v5 = vld [vmem:[#allocation2 + $0xcc] ss:$16 sps:$4 sm:$0xff]   ;;  %v2287_v6 = vld [vmem:[#allocation4 + $0xa0] ss:$8 sps:$4 sm:$0xff]   ;;  %v2290_v10 = vld [vmem:[#allocation4 + $0xb0] ss:$8 sps:$4 sm:$0xff]   ;;  %s367_s29 = scalar_lea.vmem %s2738_s9, %s1865_s17 }
  0x5e   : > { %813 = vmatpush1.bf16.msra.mxu1 %v2173_v14  ;;  %v2288_v7 = vld [vmem:[#allocation4 + $0xb4] ss:$8 sps:$4 sm:$0xff]   ;;  %v2222_v8 = vld [vmem:[#allocation2 + $0xc8] ss:$16 sps:$4 sm:$0xff]   ;;  %v2291_v11 = vld [vmem:[#allocation4 + $0xc4] ss:$8 sps:$4 sm:$0xff]  }
  0x5f   : > { %814 = vmatprep.subr.bf16.mxu1 %v2174_v15  ;;  %v2227_v9 = vld [vmem:[#allocation2 + $0xec] ss:$16 sps:$4 sm:$0xff]   ;;  %v2225_v12 = vld [vmem:[#allocation2 + $0xe8] ss:$16 sps:$4 sm:$0xff]  }
  0x60   : > { %1333 = vmatpush1.bf16.msra.mxu0 %v2266_v39  ;;  %v2293_v14 = vld [vmem:[#allocation4 + $0xc0] ss:$8 sps:$4 sm:$0xff]   ;;  %v2294_v15 = vld [vmem:[#allocation4 + $0xd4] ss:$8 sps:$4 sm:$0xff]   ;;  %v2296_v31 = vld [vmem:[#allocation4 + $0xd0] ss:$8 sps:$4 sm:$0xff]  }
  0x61   : > { %1334 = vmatprep.subr.bf16.mxu0 %v2267_v40  ;;  %v2246_v26 = vld [vmem:[#allocation2 + $0x1a8] ss:$16 sps:$4 sm:$0xff]   ;;  %v2251_v27 = vld [vmem:[#allocation2 + $0x1cc] ss:$16 sps:$4 sm:$0xff]   ;;  %v2624_v40 = vld [vmem:[%s2731_s2] sm:$0xf] }
  0x62   : > { %815 = vmatpush1.bf16.msra.mxu1 %v2176_v16  ;;  %v2228_v16 = vld [vmem:[#allocation2 + $0x108] ss:$16 sps:$4 sm:$0xff]   ;;  %v2254_v29 = vld [vmem:[#allocation2 + $0x1ec] ss:$16 sps:$4 sm:$0xff]  }
  0x63   : > { %816 = vmatprep.subr.bf16.mxu1 %v2177_v17  ;;  %v2233_v17 = vld [vmem:[#allocation2 + $0x12c] ss:$16 sps:$4 sm:$0xff]   ;;  %v2302_v35 = vld [vmem:[#allocation4 + $0xf0] ss:$8 sps:$4 sm:$0xff]  }
  0x64   : > { %1335 = vmatpush1.bf16.msra.mxu0 %v2269_v45  ;;  %v2297_v32 = vld [vmem:[#allocation4 + $0xe4] ss:$8 sps:$4 sm:$0xff]  }
  0x65   : > { %1336 = vmatprep.subr.bf16.mxu0 %v2270_v47  ;;  %v2305_v36 = vld [vmem:[#allocation4 + $0x104] ss:$8 sps:$4 sm:$0xff]  }
  0x66   : > { %817 = vmatpush1.bf16.msra.mxu1 %v2179_v18  ;;  %v2231_v18 = vld [vmem:[#allocation2 + $0x128] ss:$16 sps:$4 sm:$0xff]  }
  0x67   : > { %818 = vmatprep.subr.bf16.mxu1 %v2180_v19  ;;  %v2236_v19 = vld [vmem:[#allocation2 + $0x14c] ss:$16 sps:$4 sm:$0xff]  }
  0x68   : > { %1337 = vmatpush1.bf16.msra.mxu0 %v2272_v49 }
  0x69   : > { %1338 = vmatprep.subr.bf16.mxu0 %v2273_v50 }
  0x6a   : > { %819 = vmatpush1.bf16.msra.mxu1 %v2182_v20  ;;  %v2234_v20 = vld [vmem:[#allocation2 + $0x148] ss:$16 sps:$4 sm:$0xff]  }
  0x6b   : > { %820 = vmatprep.subr.bf16.mxu1 %v2183_v21  ;;  %v2239_v21 = vld [vmem:[#allocation2 + $0x16c] ss:$16 sps:$4 sm:$0xff]  }
  0x6c   : > { %1339 = vmatpush1.bf16.msra.mxu0 %v2275_v53 }
  0x6d   : > { %1340 = vmatprep.subr.bf16.mxu0 %v2276_v55 }
  0x6e   : > { %821 = vmatpush1.bf16.msra.mxu1 %v2185_v22  ;;  %v2237_v22 = vld [vmem:[#allocation2 + $0x168] ss:$16 sps:$4 sm:$0xff]  }
  0x6f   : > { %822 = vmatprep.subr.bf16.mxu1 %v2186_v23  ;;  %v2242_v23 = vld [vmem:[#allocation2 + $0x18c] ss:$16 sps:$4 sm:$0xff]  }
  0x70   : > { %1341 = vmatpush1.bf16.msra.mxu0 %v2278_v58  ;;  %v2303_v58 = vld [vmem:[#allocation4 + $0x100] ss:$8 sps:$4 sm:$0xff]  }
  0x71   : > { %1342 = vmatprep.subr.bf16.mxu0 %v2279_v59 }
  0x72   : > { %823 = vmatpush1.bf16.msra.mxu1 %v2188_v24  ;;  %v2240_v24 = vld [vmem:[#allocation2 + $0x188] ss:$16 sps:$4 sm:$0xff]  }
  0x73   : > { %824 = vmatprep.subr.bf16.mxu1 %v2189_v25  ;;  %v2248_v25 = vld [vmem:[#allocation2 + $0x1ac] ss:$16 sps:$4 sm:$0xff]  }
  0x74   : > { %1343 = vmatpush1.bf16.msra.mxu0 %v2281_v62 }
  0x75   : > { %1344 = vmatprep.subr.bf16.mxu0 %v2282_v63 }
  0x76   : > { %825 = vmatpush1.bf16.msra.mxu1 %v2191_v28  ;;  %v2249_v28 = vld [vmem:[#allocation2 + $0x1c8] ss:$16 sps:$4 sm:$0xff]  }
  0x77   : > { %826 = vmatprep.subr.bf16.mxu1 %v2192_v30  ;;  %v2252_v30 = vld [vmem:[#allocation2 + $0x1e8] ss:$16 sps:$4 sm:$0xff]  }
  0x78   : > { %1345 = vmatpush1.bf16.msra.mxu0 %v2284_v2 }
  0x79   : > { %1346 = vmatprep.subr.bf16.mxu0 %v2285_v3 }
  0x7a   : > { %827 = vmatpush1.bf16.msra.mxu1 %v2194_v33  ;;  %v2299_v33 = vld [vmem:[#allocation4 + $0xe0] ss:$8 sps:$4 sm:$0xff]  }
  0x7b   : > { %828 = vmatprep.subr.bf16.mxu1 %v2195_v34  ;;  %v2300_v34 = vld [vmem:[#allocation4 + $0xf4] ss:$8 sps:$4 sm:$0xff]  }
  0x7c   : > { %1347 = vmatpush1.bf16.msra.mxu0 %v2287_v6 }
  0x7d   : > { %1348 = vmatprep.subr.bf16.mxu0 %v2288_v7  ;;  %v2311_v7 = vld [vmem:[#allocation4 + $0x124] ss:$8 sps:$4 sm:$0xff]  }
  0x7e   : > { %829 = vmatpush1.bf16.msra.mxu1 %v2197_v37  ;;  %v440_v37 = vlaneseq }
  0x7f   : > { %830 = vmatprep.subr.bf16.mxu1 %v2198_v38 }
  0x80   : > { %1349 = vmatpush1.bf16.msra.mxu0 %v2290_v10  ;;  %v2618_v38 = vshrl.u32 %v440_v37, 7 }
  0x81   : > { %1350 = vmatprep.subr.bf16.mxu0 %v2291_v11  ;;  %v2309_v11 = vld [vmem:[#allocation4 + $0x120] ss:$8 sps:$4 sm:$0xff]  }
  0x82   : > { %831 = vmatpush1.bf16.msra.mxu1 %v2200_v41  ;;  %v442_v39 = vsub.s32 0, %v2618_v38  ;;  %v446_v41 = vsub.s32 1, %v2618_v38 }
  0x83   : > { %853 = vmatprep.subr.bf16.mxu1 %v2206_v43 }
  0x84   : > { %1351 = vmatpush1.bf16.msra.mxu0 %v2293_v14  ;;  %v447_v43 = vrot.slane %v2624_v40, %v446_v41  ;;  %v2312_v14 = vld [vmem:[#allocation4 + $0x130] ss:$8 sps:$4 sm:$0xff]  }
  0x85   : > { %833 = vmatmul.mubr.bf16.vlgmr.msra.gmra.mrb[0].mxu1 %v2603_v42  ;;  %1352 = vmatprep.subr.bf16.mxu0 %v2294_v15  ;;  %v2317_v15 = vld [vmem:[#allocation4 + $0x144] ss:$8 sps:$4 sm:$0xff]  }
  0x86   : > { %854 = vmatpush1.bf16.msra.mxu1 %v2204_v44  ;;  %842 = vmatprep.mubr.bf16.mxu1 %v2606_v48 }
  0x87   : > { %855 = vmatprep.subr.bf16.mxu1 %v2209_v46 }
  0x88   : > { %1353 = vmatpush1.bf16.msra.mxu0 %v2296_v31  ;;  %v2341_v31 = vld [vmem:[#allocation4 + $0x1c4] ss:$8 sps:$4 sm:$0xff]  }
  0x89   : > { %1354 = vmatprep.subr.bf16.mxu0 %v2297_v32  ;;  %v2339_v32 = vld [vmem:[#allocation4 + $0x1c0] ss:$8 sps:$4 sm:$0xff]  }
  0x8a   : > { %856 = vmatpush1.bf16.msra.mxu1 %v2207_v51 }
  0x8b   : > { %857 = vmatprep.subr.bf16.mxu1 %v2212_v52 }
  0x8c   : > { %1355 = vmatpush1.bf16.msra.mxu0 %v2299_v33  ;;  %v2344_v33 = vld [vmem:[#allocation4 + $0x1d4] ss:$8 sps:$4 sm:$0xff]  }
  0x8d   : > { %843 = vmatmul.mubr.bf16.gmra.mrb[4].mxu1 %v2611_v54  ;;  %1356 = vmatprep.subr.bf16.mxu0 %v2300_v34  ;;  %v450_v34 = vsub.s32 2, %v2618_v38 }
  0x8e   : > { %858 = vmatpush1.bf16.msra.mxu1 %v2210_v56  ;;  %885 = vmatprep.mubr.bf16.mxu1 %v2599_v13  ;;  %v2230_v13 = vld [vmem:[#allocation2 + $0x10c] ss:$16 sps:$4 sm:$0xff]  }
  0x8f   : > { %859 = vmatprep.subr.bf16.mxu1 %v2215_v57  ;;  %v451_v37 = vrot.slane %v2624_v40, %v450_v34 }
  0x90   : > { %1357 = vmatpush1.bf16.msra.mxu0 %v2302_v35  ;;  %v454_v35 = vsub.s32 3, %v2618_v38 }
  0x91   : > { %1379 = vmatprep.subr.bf16.mxu0 %v2305_v36  ;;  %v2342_v36 = vld [vmem:[#allocation4 + $0x1d0] ss:$8 sps:$4 sm:$0xff]  }
  0x92   : > { %860 = vmatpush1.bf16.msra.mxu1 %v2213_v60  ;;  %v2308_v60 = vld [vmem:[#allocation4 + $0x114] ss:$8 sps:$4 sm:$0xff]  }
  0x93   : > { %861 = vmatprep.subr.bf16.mxu1 %v2218_v61 }
  0x96   : > { %862 = vmatpush1.bf16.msra.mxu1 %v2216_v0 }
  0x97   : > { %863 = vmatprep.subr.bf16.mxu1 %v2221_v1 }
  0x9a   : > { %864 = vmatpush1.bf16.msra.mxu1 %v2219_v4  ;;  %v2306_v4 = vld [vmem:[#allocation4 + $0x110] ss:$8 sps:$4 sm:$0xff]  }
  0x9b   : > { %865 = vmatprep.subr.bf16.mxu1 %v2224_v5 }
  0x9e   : > { %866 = vmatpush1.bf16.msra.mxu1 %v2222_v8 }
  0x9f   : > { %867 = vmatprep.subr.bf16.mxu1 %v2227_v9 }
  0xa2   : > { %868 = vmatpush1.bf16.msra.mxu1 %v2225_v12 }
  0xa3   : > { %869 = vmatprep.subr.bf16.mxu1 %v2230_v13  ;;  %v2314_v13 = vld [vmem:[#allocation4 + $0x134] ss:$8 sps:$4 sm:$0xff]  }
  0xa6   : > { %870 = vmatpush1.bf16.msra.mxu1 %v2228_v16  ;;  %v2315_v16 = vld [vmem:[#allocation4 + $0x140] ss:$8 sps:$4 sm:$0xff]  }
  0xa7   : > { %871 = vmatprep.subr.bf16.mxu1 %v2233_v17  ;;  %v2320_v17 = vld [vmem:[#allocation4 + $0x154] ss:$8 sps:$4 sm:$0xff]  }
  0xaa   : > { %872 = vmatpush1.bf16.msra.mxu1 %v2231_v18  ;;  %v2318_v18 = vld [vmem:[#allocation4 + $0x150] ss:$8 sps:$4 sm:$0xff]  }
  0xab   : > { %873 = vmatprep.subr.bf16.mxu1 %v2236_v19  ;;  %v2323_v19 = vld [vmem:[#allocation4 + $0x164] ss:$8 sps:$4 sm:$0xff]  }
  0xae   : > { %874 = vmatpush1.bf16.msra.mxu1 %v2234_v20  ;;  %v2321_v20 = vld [vmem:[#allocation4 + $0x160] ss:$8 sps:$4 sm:$0xff]  }
  0xaf   : > { %875 = vmatprep.subr.bf16.mxu1 %v2239_v21  ;;  %v2326_v21 = vld [vmem:[#allocation4 + $0x174] ss:$8 sps:$4 sm:$0xff]  }
  0xb2   : > { %876 = vmatpush1.bf16.msra.mxu1 %v2237_v22  ;;  %v2324_v22 = vld [vmem:[#allocation4 + $0x170] ss:$8 sps:$4 sm:$0xff]  }
  0xb3   : > { %877 = vmatprep.subr.bf16.mxu1 %v2242_v23  ;;  %v2329_v23 = vld [vmem:[#allocation4 + $0x184] ss:$8 sps:$4 sm:$0xff]  }
  0xb6   : > { %878 = vmatpush1.bf16.msra.mxu1 %v2240_v24  ;;  %v2327_v24 = vld [vmem:[#allocation4 + $0x180] ss:$8 sps:$4 sm:$0xff]  }
  0xb7   : > { %879 = vmatprep.subr.bf16.mxu1 %v2248_v25  ;;  %v2332_v25 = vld [vmem:[#allocation4 + $0x194] ss:$8 sps:$4 sm:$0xff]  }
  0xba   : > { %880 = vmatpush1.bf16.msra.mxu1 %v2246_v26  ;;  %v2330_v26 = vld [vmem:[#allocation4 + $0x190] ss:$8 sps:$4 sm:$0xff]  }
  0xbb   : > { %881 = vmatprep.subr.bf16.mxu1 %v2251_v27  ;;  %v2335_v27 = vld [vmem:[#allocation4 + $0x1a4] ss:$8 sps:$4 sm:$0xff]  }
  0xbe   : > { %882 = vmatpush1.bf16.msra.mxu1 %v2249_v28  ;;  %v2333_v28 = vld [vmem:[#allocation4 + $0x1a0] ss:$8 sps:$4 sm:$0xff]  }
  0xbf   : > { %883 = vmatprep.subr.bf16.mxu1 %v2254_v29  ;;  %v2338_v29 = vld [vmem:[#allocation4 + $0x1b4] ss:$8 sps:$4 sm:$0xff]  }
  0xc2   : > { %884 = vmatpush1.bf16.msra.mxu1 %v2252_v30  ;;  %v2336_v30 = vld [vmem:[#allocation4 + $0x1b0] ss:$8 sps:$4 sm:$0xff]  }
  0xc5   : > { %886 = vmatmul.mubr.bf16.vlgmr.msra.gmra.mrb[8].mxu1 %v2603_v42  ;;  %v443_v42 = vrot.slane %v2624_v40, %v442_v39 }
  0xc6   : > { %895 = vmatprep.mubr.bf16.mxu1 %v2606_v48 }
  0xcd   : > { %896 = vmatmul.mubr.bf16.gmra.mrb[12].mxu1 %v2611_v54 }
 0x158   : > { %v834_v44 = vpop.f32.mrb[0].mxu1 }
 0x159   : > { %v835_v45 = vadd.f32 %v834_v44, %v443_v42  ;;  %v836_v46 = vpop.f32.mrb[1].mxu1 }
 0x15a   : > { %v837_v47 = vadd.f32 %v836_v46, %v447_v43  ;;  %v838_v48 = vpop.f32.mrb[2].mxu1 }
 0x15b   : > { %v906_v49 = vmax.f32 %v835_v45, 0.0  ;;  %v839_v50 = vadd.f32 %v838_v48, %v443_v42  ;;  %v840_v51 = vpop.f32.mrb[3].mxu1  ;;  %v2345_v45 = vld [vmem:[#allocation4 + $0x1e0] ss:$8 sps:$4 sm:$0xff]   ;;  %v2350_v48 = vld [vmem:[#allocation4 + $0x1f4] ss:$8 sps:$4 sm:$0xff]  }
 0x15c   : > { %v841_v52 = vadd.f32 %v840_v51, %v447_v43  ;;  %v907_v54 = vmax.f32 %v837_v47, 0.0 }
 0x15d   : > { %v910_v53 = vmax.f32 %v839_v50, 0.0 }
 0x15e   : > { %v911_v55 = vmax.f32 %v841_v52, 0.0 }
 0x15f   : > { %v922_v56 = vpack.c.bf16 %v910_v53, %v906_v49 }
 0x160   : > { %v923_v57 = vpack.c.bf16 %v911_v55, %v907_v54  ;;  %v844_v59 = vpop.f32.mrb[4].mxu1  ;;  %v2348_v54 = vld [vmem:[#allocation4 + $0x1f0] ss:$8 sps:$4 sm:$0xff]  }
 0x161   : > { %v845_v61 = vadd.f32 %v844_v59, %v443_v42  ;;  %v846_v62 = vpop.f32.mrb[5].mxu1 }
 0x162   : > { %1358 = vmatprep.mubr.bf16.mxu0 %v923_v57  ;;  %v847_v63 = vadd.f32 %v846_v62, %v447_v43  ;;  %v848_v0 = vpop.f32.mrb[6].mxu1  ;;  %v2352_v62 = vld [vmem:[%s2734_s5] sm:$0xff]  }
 0x163   : > { %1359 = vmatmul.mubr.bf16.vlgmr.msra.gmra.mrb[0].mxu0 %v922_v56  ;;  %v914_v1 = vmax.f32 %v845_v61, 0.0  ;;  %v849_v2 = vadd.f32 %v848_v0, %v443_v42  ;;  %v850_v3 = vpop.f32.mrb[7].mxu1  ;;  %v2347_v42 = vld [vmem:[#allocation4 + $0x1e4] ss:$8 sps:$4 sm:$0xff]  }
 0x164   : > { %1380 = vmatpush1.bf16.msra.mxu0 %v2303_v58  ;;  %v915_v5 = vmax.f32 %v847_v63, 0.0  ;;  %v851_v6 = vadd.f32 %v850_v3, %v447_v43  ;;  %v455_v43 = vrot.slane %v2624_v40, %v454_v35  ;;  %v2351_v40 = vld [vmem:[%s2734_s5 + $0x40] sm:$0xff]  }
 0x165   : > { %1381 = vmatprep.subr.bf16.mxu0 %v2308_v60  ;;  %v918_v8 = vmax.f32 %v849_v2, 0.0 }
 0x166   : > { %v919_v9 = vmax.f32 %v851_v6, 0.0 }
 0x167   : > { %v926_v10 = vpack.c.bf16 %v918_v8, %v914_v1  ;;  %v2353_v1 = vld [vmem:[%s2734_s5 + $0x48] sm:$0xff]  }
 0x168   : > { %1382 = vmatpush1.bf16.msra.mxu0 %v2306_v4  ;;  %v927_v12 = vpack.c.bf16 %v919_v9, %v915_v5 }
 0x169   : > { %1383 = vmatprep.subr.bf16.mxu0 %v2311_v7  ;;  %v2354_v7 = vld [vmem:[%s2734_s5 + $0x8] sm:$0xff]  }
 0x16a   : > { %1368 = vmatprep.mubr.bf16.mxu0 %v927_v12 }
 0x16b   : > { %1369 = vmatmul.mubr.bf16.gmra.mrb[4].mxu0 %v926_v10  ;;  %v2355_v10 = vld [vmem:[%s2734_s5 + $0x50] sm:$0xff]  }
 0x16c   : > { %1384 = vmatpush1.bf16.msra.mxu0 %v2309_v11 }
 0x16d   : > { %1385 = vmatprep.subr.bf16.mxu0 %v2314_v13 }
 0x170   : > { %1386 = vmatpush1.bf16.msra.mxu0 %v2312_v14 }
 0x171   : > { %1387 = vmatprep.subr.bf16.mxu0 %v2317_v15  ;;  %v2356_v15 = vld [vmem:[%s2734_s5 + $0x10] sm:$0xff]  }
 0x174   : > { %1388 = vmatpush1.bf16.msra.mxu0 %v2315_v16  ;;  %v2357_v16 = vld [vmem:[%s2734_s5 + $0x58] sm:$0xff]  }
 0x175   : > { %1389 = vmatprep.subr.bf16.mxu0 %v2320_v17  ;;  %v2358_v17 = vld [vmem:[%s2734_s5 + $0x18] sm:$0xff]  }
 0x178   : > { %1390 = vmatpush1.bf16.msra.mxu0 %v2318_v18  ;;  %v2359_v18 = vld [vmem:[%s2734_s5 + $0x60] sm:$0xff]  }
 0x179   : > { %1391 = vmatprep.subr.bf16.mxu0 %v2323_v19  ;;  %v2360_v19 = vld [vmem:[%s2734_s5 + $0x20] sm:$0xff]  }
 0x17c   : > { %1392 = vmatpush1.bf16.msra.mxu0 %v2321_v20  ;;  %v2361_v20 = vld [vmem:[%s2734_s5 + $0x68] sm:$0xff]  }
 0x17d   : > { %1393 = vmatprep.subr.bf16.mxu0 %v2326_v21  ;;  %v2362_v21 = vld [vmem:[%s2734_s5 + $0x28] sm:$0xff]  }
 0x180   : > { %1394 = vmatpush1.bf16.msra.mxu0 %v2324_v22  ;;  %v2363_v22 = vld [vmem:[%s2734_s5 + $0x70] sm:$0xff]  }
 0x181   : > { %1395 = vmatprep.subr.bf16.mxu0 %v2329_v23  ;;  %v2364_v23 = vld [vmem:[%s2734_s5 + $0x30] sm:$0xff]  }
 0x184   : > { %1396 = vmatpush1.bf16.msra.mxu0 %v2327_v24  ;;  %v2365_v24 = vld [vmem:[%s2734_s5 + $0x78] sm:$0xff]  }
 0x185   : > { %1397 = vmatprep.subr.bf16.mxu0 %v2332_v25  ;;  %v2366_v25 = vld [vmem:[%s2734_s5 + $0x38] sm:$0xff]  }
 0x188   : > { %1398 = vmatpush1.bf16.msra.mxu0 %v2330_v26  ;;  %v2367_v26 = vld [vmem:[%s2736_s7] sm:$0xff]  }
 0x189   : > { %1399 = vmatprep.subr.bf16.mxu0 %v2335_v27  ;;  %v2368_v27 = vld [vmem:[%s2736_s7 + $0x8] sm:$0xff]   ;;  %2084 = vmatprep.subr.bf16.mxu1 %v2367_v26 }
 0x18a   : > { %2085 = vmatpush3.bf16.msra.mxu1 %v2367_v26 }
 0x18b   : > { %2086 = vmatprep.subr.bf16.mxu1 %v2368_v27 }
 0x18c   : > { %1400 = vmatpush1.bf16.msra.mxu0 %v2333_v28  ;;  %v2369_v28 = vld [vmem:[%s2736_s7 + $0x10] sm:$0xff]  }
 0x18d   : > { %1401 = vmatprep.subr.bf16.mxu0 %v2338_v29  ;;  %v994_v29 = vld [vmem:[%s2733_s4] sm:$0x3] }
 0x18e   : > { %2087 = vmatpush3.bf16.msra.mxu1 %v2368_v27 }
 0x18f   : > { %2088 = vmatprep.subr.bf16.mxu1 %v2369_v28 }
 0x190   : > { %1402 = vmatpush1.bf16.msra.mxu0 %v2336_v30  ;;  %v999_v30 = vrot.slane %v994_v29, %v442_v39 }
 0x191   : > { %1403 = vmatprep.subr.bf16.mxu0 %v2341_v31  ;;  %v1003_v31 = vrot.slane %v994_v29, %v446_v41 }
 0x192   : > { %2089 = vmatpush3.bf16.msra.mxu1 %v2369_v28 }
 0x194   : > { %1404 = vmatpush1.bf16.msra.mxu0 %v2339_v32 }
 0x195   : > { %1405 = vmatprep.subr.bf16.mxu0 %v2344_v33 }
 0x198   : > { %v887_v44 = vpop.f32.mrb[8].mxu1  ;;  %1406 = vmatpush1.bf16.msra.mxu0 %v2342_v36 }
 0x199   : > { %v888_v46 = vadd.f32 %v887_v44, %v451_v37  ;;  %v889_v47 = vpop.f32.mrb[9].mxu1  ;;  %1407 = vmatprep.subr.bf16.mxu0 %v2347_v42 }
 0x19a   : > { %v890_v49 = vadd.f32 %v889_v47, %v455_v43  ;;  %v891_v50 = vpop.f32.mrb[10].mxu1 }
 0x19b   : > { %v892_v51 = vadd.f32 %v891_v50, %v451_v37  ;;  %v893_v52 = vpop.f32.mrb[11].mxu1  ;;  %v908_v55 = vmax.f32 %v888_v46, 0.0 }
 0x19c   : > { %v894_v53 = vadd.f32 %v893_v52, %v455_v43  ;;  %1408 = vmatpush1.bf16.msra.mxu0 %v2345_v45  ;;  %v909_v57 = vmax.f32 %v890_v49, 0.0 }
 0x19d   : > { %v912_v56 = vmax.f32 %v892_v51, 0.0  ;;  %1409 = vmatprep.subr.bf16.mxu0 %v2350_v48 }
 0x19e   : > { %v913_v58 = vmax.f32 %v894_v53, 0.0 }
 0x19f   : > { %v924_v59 = vpack.c.bf16 %v912_v56, %v908_v55 }
 0x1a0   : > { %v925_v60 = vpack.c.bf16 %v913_v58, %v909_v57  ;;  %v897_v61 = vpop.f32.mrb[12].mxu1  ;;  %1410 = vmatpush1.bf16.msra.mxu0 %v2348_v54 }
 0x1a1   : > { %v898_v63 = vadd.f32 %v897_v61, %v451_v37  ;;  %v899_v0 = vpop.f32.mrb[13].mxu1  ;;  %2046 = vmatprep.subr.bf16.mxu0 %v2351_v40  ;;  %v2371_v61 = vld [vmem:[%s2736_s7 + $0x20] sm:$0xff]  }
 0x1a2   : > { %v900_v2 = vadd.f32 %v899_v0, %v455_v43  ;;  %v901_v3 = vpop.f32.mrb[14].mxu1  ;;  %1411 = vmatprep.mubr.bf16.mxu0 %v925_v60  ;;  %v2370_v60 = vld [vmem:[%s2736_s7 + $0x18] sm:$0xff]  }
 0x1a3   : > { %v902_v4 = vadd.f32 %v901_v3, %v451_v37  ;;  %v903_v5 = vpop.f32.mrb[15].mxu1  ;;  %1412 = vmatmul.mubr.bf16.vlgmr.msra.gmra.mrb[0].mxu0 %v924_v59  ;;  %v916_v8 = vmax.f32 %v898_v63, 0.0  ;;  %2090 = vmatprep.subr.bf16.mxu1 %v2370_v60  ;;  %v2373_v63 = vld [vmem:[%s2736_s7 + $0x30] sm:$0xff]   ;;  %v2374_v0 = vld [vmem:[%s2736_s7 + $0x38] sm:$0xff]  }
 0x1a4   : > { %v904_v6 = vadd.f32 %v903_v5, %v455_v43  ;;  %2047 = vmatpush3.bf16.msra.mxu0 %v2352_v62  ;;  %v917_v11 = vmax.f32 %v900_v2, 0.0  ;;  %2091 = vmatpush3.bf16.msra.mxu1 %v2370_v60  ;;  %v2372_v62 = vld [vmem:[%s2736_s7 + $0x28] sm:$0xff]   ;;  %v1998_v2 = vld [vmem:[%s2735_s6] ss:$0 sm:$0xff] }
 0x1a5   : > { %v920_v9 = vmax.f32 %v902_v4, 0.0  ;;  %2048 = vmatprep.subr.bf16.mxu0 %v2353_v1  ;;  %2092 = vmatprep.subr.bf16.mxu1 %v2371_v61 }
 0x1a6   : > { %v921_v12 = vmax.f32 %v904_v6, 0.0 }
 0x1a7   : > { %v928_v13 = vpack.c.bf16 %v920_v9, %v916_v8 }
 0x1a8   : > { %v929_v14 = vpack.c.bf16 %v921_v12, %v917_v11  ;;  %2049 = vmatpush3.bf16.msra.mxu0 %v2354_v7  ;;  %2093 = vmatpush3.bf16.msra.mxu1 %v2371_v61 }
 0x1a9   : > { %2050 = vmatprep.subr.bf16.mxu0 %v2355_v10  ;;  %2094 = vmatprep.subr.bf16.mxu1 %v2372_v62 }
 0x1aa   : > { %1421 = vmatprep.mubr.bf16.mxu0 %v929_v14 }
 0x1ab   : > { %1422 = vmatmul.mubr.bf16.gmra.mrb[4].mxu0 %v928_v13 }
 0x1ac   : > { %2051 = vmatpush3.bf16.msra.mxu0 %v2356_v15  ;;  %2095 = vmatpush3.bf16.msra.mxu1 %v2372_v62 }
 0x1ad   : > { %2052 = vmatprep.subr.bf16.mxu0 %v2357_v16  ;;  %2096 = vmatprep.subr.bf16.mxu1 %v2373_v63 }
 0x1b0   : > { %2053 = vmatpush3.bf16.msra.mxu0 %v2358_v17  ;;  %2097 = vmatpush3.bf16.msra.mxu1 %v2373_v63 }
 0x1b1   : > { %2054 = vmatprep.subr.bf16.mxu0 %v2359_v18  ;;  %2098 = vmatprep.subr.bf16.mxu1 %v2374_v0 }
 0x1b4   : > { %2055 = vmatpush3.bf16.msra.mxu0 %v2360_v19  ;;  %2099 = vmatpush3.bf16.msra.mxu1 %v2374_v0 }
 0x1b5   : > { %2056 = vmatprep.subr.bf16.mxu0 %v2361_v20 }
 0x1b8   : > { %2057 = vmatpush3.bf16.msra.mxu0 %v2362_v21 }
 0x1b9   : > { %2058 = vmatprep.subr.bf16.mxu0 %v2363_v22 }
 0x1bc   : > { %2059 = vmatpush3.bf16.msra.mxu0 %v2364_v23 }
 0x1bd   : > { %2060 = vmatprep.subr.bf16.mxu0 %v2365_v24 }
 0x1c0   : > { %2061 = vmatpush3.bf16.msra.mxu0 %v2366_v25  ;;  %v2015_v25 = vld [vmem:[%s2737_s8] ss:$0 sm:$0xff] }
 0x276   : > { %v1413_v32 = vpop.f32.mrb[0].mxu0 }
 0x277   : > { %v2104_v33 = vadd.f32 %v1413_v32, %v999_v30  ;;  %v1415_v34 = vpop.f32.mrb[1].mxu0 }
 0x278   : > { %v2105_v35 = vadd.f32 %v1415_v34, %v1003_v31  ;;  %v1417_v36 = vpop.f32.mrb[2].mxu0 }
 0x279   : > { %v2106_v37 = vadd.f32 %v1417_v36, %v999_v30  ;;  %v1419_v42 = vpop.f32.mrb[3].mxu0  ;;  %v1432_v44 = vmax.f32 %v2104_v33, 0.0 }
 0x27a   : > { %v2107_v43 = vadd.f32 %v1419_v42, %v1003_v31  ;;  %v1433_v46 = vmax.f32 %v2105_v35, 0.0 }
 0x27b   : > { %v1434_v45 = vmax.f32 %v2106_v37, 0.0 }
 0x27c   : > { %v1435_v47 = vmax.f32 %v2107_v43, 0.0 }
 0x27d   : > { %v1440_v48 = vpack.c.bf16 %v1434_v45, %v1432_v44 }
 0x27e   : > { %v1441_v49 = vpack.c.bf16 %v1435_v47, %v1433_v46  ;;  %v1423_v50 = vpop.f32.mrb[4].mxu0 }
 0x27f   : > { %v2108_v51 = vadd.f32 %v1423_v50, %v999_v30  ;;  %v1425_v39 = vpop.f32.mrb[5].mxu0 }
 0x280   : > { %v2109_v52 = vadd.f32 %v1425_v39, %v1003_v31  ;;  %v1427_v38 = vpop.f32.mrb[6].mxu0  ;;  %1611 = vmatprep.mubr.bf16.mxu0 %v1441_v49 }
 0x281   : > { %v2110_v41 = vadd.f32 %v1427_v38, %v999_v30  ;;  %v1429_v53 = vpop.f32.mrb[7].mxu0  ;;  %1612 = vmatmul.mubr.bf16.vlgmr.msra.gmra.mrb[8].mxu0 %v1440_v48  ;;  %v1436_v55 = vmax.f32 %v2108_v51, 0.0 }
 0x282   : > { %v2111_v54 = vadd.f32 %v1429_v53, %v1003_v31  ;;  %v1437_v40 = vmax.f32 %v2109_v52, 0.0 }
 0x283   : > { %v1438_v56 = vmax.f32 %v2110_v41, 0.0 }
 0x284   : > { %v1439_v57 = vmax.f32 %v2111_v54, 0.0 }
 0x285   : > { %v1442_v58 = vpack.c.bf16 %v1438_v56, %v1436_v55 }
 0x286   : > { %v1443_v59 = vpack.c.bf16 %v1439_v57, %v1437_v40 }
 0x288   : > { %1619 = vmatprep.mubr.bf16.mxu0 %v1443_v59 }
 0x289   : > { %1620 = vmatmul.mubr.bf16.gmra.mrb[12].mxu0 %v1442_v58 }
 0x354   : > { %v2062_v1 = vpop.f32.mrb[8].mxu0 }
 0x355   : > { %v2063_v3 = vpop.f32.mrb[9].mxu0 }
 0x356   : > { %v2064_v4 = vadd.f32 %v2063_v3, %v2062_v1  ;;  %v2065_v5 = vpop.f32.mrb[10].mxu0 }
 0x357   : > { %v2066_v6 = vpop.f32.mrb[11].mxu0 }
 0x358   : > { %v1614_v7 = vadd.f32 %v2064_v4, %v1998_v2  ;;  %v2067_v8 = vadd.f32 %v2066_v6, %v2065_v5 }
 0x35a   : > { %v1617_v9 = vadd.f32 %v2067_v8, %v1998_v2  ;;  %v1628_v10 = vmax.f32 %v1614_v7, 0.0 }
 0x35c   : > { %v1629_v11 = vmax.f32 %v1617_v9, 0.0  ;;  %v2068_v12 = vpop.f32.mrb[12].mxu0 }
 0x35d   : > { %v2069_v13 = vpop.f32.mrb[13].mxu0 }
 0x35e   : > { %v2070_v14 = vadd.f32 %v2069_v13, %v2068_v12  ;;  %v2071_v15 = vpop.f32.mrb[14].mxu0  ;;  %v1632_v16 = vpack.c.bf16 %v1629_v11, %v1628_v10 }
 0x35f   : > { %v2072_v17 = vpop.f32.mrb[15].mxu0 }
 0x360   : > { %v1622_v18 = vadd.f32 %v2070_v14, %v1998_v2  ;;  %v2073_v19 = vadd.f32 %v2072_v17, %v2071_v15  ;;  %2100 = vmatprep.mubr.bf16.mxu1 %v1632_v16 }
 0x362   : > { %v1625_v20 = vadd.f32 %v2073_v19, %v1998_v2  ;;  %v1630_v21 = vmax.f32 %v1622_v18, 0.0 }
 0x364   : > { %v1631_v22 = vmax.f32 %v1625_v20, 0.0 }
 0x366   : > { %v1633_v23 = vpack.c.bf16 %v1631_v22, %v1630_v21 }
 0x368   : > { %2101 = vmatmul.mubr.bf16.vlgmr.msra.gmra.mrb[16].mxu1 %v1633_v23 }
 0x43b   : > { %v2102_v24 = vpop.f32.mrb[16].mxu1 }
 0x43c   : > { %v1739_v26 = vpop.f32.mrb[17].mxu1  ;;  %v1748_v28 = vadd.f32 %v2102_v24, %v2015_v25 }
 0x43d   : > { %v2103_v27 = vpop.f32.mrb[18].mxu1  ;;  %v1740_v31 = vadd.f32 %v2015_v25, %v1739_v26 }
 0x43e   : > { %v1751_v29 = vadd.f32 %v2103_v27, %v2015_v25  ;;  %v1742_v30 = vpop.f32.mrb[19].mxu1 }
 0x43f   : > { %v1743_v32 = vadd.f32 %v2015_v25, %v1742_v30 }
 0x440   : > { %v2043_v33 = vpack.c.bf16 %v1751_v29, %v1748_v28 }
 0x441   : > { %v2038_v34 = vpack.c.bf16 %v1743_v32, %v1740_v31 }
 0x442   : > { %2045 = vst [vmem:[%s367_s29 + $0x8] sm:$0xff] %v2043_v33  }
 0x443   : > { %2039 = vst [vmem:[%s367_s29] sm:$0xff] %v2038_v34  }
 0x444 PF: > { %s21_s30 = sadd.s32 1, %s2445_s30  }
 0x445   : > { %p18_p2 = scmp.ge.s32.totalorder %s21_s30, 4  }
 0x447   :  { %20 = sbr.rel (!%p18_p2) target bundleno = 2 (0x2), region = 95 }
 0x44e   :  { %1796 = vsyncpa [#allocation3], 1 }
 0x44f   :  { %1798 = vsyncpa [#allocation3 + $0x1], 1 }
 0x450   :  { %1799 = vsyncpa [#allocation5], 1 }

</bundles_post_ra>
